<compile_context>
chip_gen: v6e
topology: v6e:2x2x1
jax: 0.10.0
libtpu: 0.0.40
codegen_flags: <defaults>
</compile_context>

<pallas_src>
import functools

import jax
import jax.numpy as jnp
from jax.experimental import pallas as pl
from jax.experimental.pallas import tpu as pltpu


# ---------------------------------------------------------------------------
# Parameter packing: one [K, H] f32 slab (VMEM, grid-resident) + [4] SMEM scalars
# ---------------------------------------------------------------------------
def pack_params(p):
    f, h = p["w1"].shape
    m, h2 = p["prototypes"].shape
    c = p["wc"].shape[1]
    assert h2 == h
    assert h % 8 == 0 and f % 8 == 0, "hidden/input dims must be sublane aligned"
    assert m <= h and c <= h, "prototype/class count must fit the hidden lane width"
    assert h <= 128 and m <= 128 and c <= 128, "output slab assumes <=128 lanes"

    proto_t = jnp.zeros((h, h), jnp.float32).at[:, :m].set(
        p["prototypes"].T.astype(jnp.float32))
    wc_blk = jnp.zeros((h, h), jnp.float32).at[:m, :c].set(
        p["wc"].astype(jnp.float32))

    pnorm = jnp.sum(p["prototypes"].astype(jnp.float32) ** 2, axis=1)  # [M]

    misc = jnp.zeros((16, h), jnp.float32)
    misc = misc.at[0, :].set(p["b1"].reshape(-1))
    misc = misc.at[1, :].set(p["b2"].reshape(-1))
    misc = misc.at[2, :].set(p["b3"].reshape(-1))
    misc = misc.at[3, :].set(p["ba1"].reshape(-1))
    misc = misc.at[4, :].set(p["bm1"].reshape(-1))
    misc = misc.at[5, :].set(p["bm2"].reshape(-1))
    misc = misc.at[6, :c].set(p["bc"].reshape(-1))
    misc = misc.at[7, :m].set(pnorm)
    # assignment head: softmax over 2 == sigmoid(l0 - l1); pre-fold the diff row.
    misc = misc.at[8, :].set(p["wa2"][:, 0] - p["wa2"][:, 1])

    slab = jnp.concatenate(
        [p["w1"], p["w2"], p["w3"], p["wa1"], p["wm1"], p["wm2"],
         proto_t, wc_blk, misc], axis=0).astype(jnp.float32)

    eps = jnp.broadcast_to(p["eps"].reshape(-1), (3,)).astype(jnp.float32)
    ba2 = p["ba2"].reshape(-1)
    ba2_diff = (ba2[0] - ba2[1]).reshape(1).astype(jnp.float32)
    scal = jnp.concatenate([eps, ba2_diff], axis=0)  # [4] -> SMEM

    return slab, scal, (f, h, m, c, slab.shape[0])


# ---------------------------------------------------------------------------
# Fused per-graph forward kernel (runs once per grid step; grid = batch)
# ---------------------------------------------------------------------------
def _make_fused_kernel(n, f, h, m, c):
    off_w2 = f
    off_w3 = off_w2 + h
    off_wa1 = off_w3 + h
    off_wm1 = off_wa1 + h
    off_wm2 = off_wm1 + h
    off_pt = off_wm2 + h
    off_wc = off_pt + h
    off_misc = off_wc + h
    inv_n = 1.0 / float(n)

    def pad128(v):  # [1, w] -> [1, 128] lane-dense row
        w = v.shape[-1]
        if w == 128:
            return v
        return jnp.concatenate(
            [v, jnp.zeros((v.shape[0], 128 - w), jnp.float32)], axis=-1)

    def kernel(scal_ref, a_ref, x_ref, p_ref, out_ref):
        a = a_ref[...]                       # [N, N]
        x = x_ref[...]                       # [N, F]
        eps1 = scal_ref[0]
        eps2 = scal_ref[1]
        eps3 = scal_ref[2]
        ba2_diff = scal_ref[3]

        misc = p_ref[off_misc:off_misc + 16, :]       # [16, H]
        b1, b2, b3 = misc[0:1, :], misc[1:2, :], misc[2:3, :]
        ba1, bm1, bm2 = misc[3:4, :], misc[4:5, :], misc[5:6, :]
        bc = misc[6:7, :]                    # zeros beyond c
        pnorm = misc[7:8, :]                 # zeros beyond m
        wa2d = misc[8:9, :]                  # [1, H]

        def gin_layer(hh, w, b, eps):
            # (1 + eps) * h_i + sum_j A_ij h_j, then Linear + ReLU
            agg = jnp.dot(a, hh, preferred_element_type=jnp.float32) + (1.0 + eps) * hh
            z = jnp.dot(agg, w, preferred_element_type=jnp.float32) + b
            return jnp.maximum(z, 0.0)

        h1 = gin_layer(x, p_ref[0:f, :], b1, eps1)
        h2 = gin_layer(h1, p_ref[off_w2:off_w2 + h, :], b2, eps2)
        h3 = gin_layer(h2, p_ref[off_w3:off_w3 + h, :], b3, eps3)   # [N, H]

        # node assignment head (softmax over 2 == sigmoid of logit difference)
        t = jnp.tanh(jnp.dot(h3, p_ref[off_wa1:off_wa1 + h, :],
                             preferred_element_type=jnp.float32) + ba1)
        zd = jnp.sum(t * wa2d, axis=-1, keepdims=True) + ba2_diff    # [N, 1]
        lp = 0.5 * (jnp.tanh(0.5 * zd) + 1.0)     # sigmoid via EUP tanh
        ln = 1.0 - lp

        # A @ [lp | 1]: assignment aggregation and row-sums in one MXU dot
        ones_col = jnp.ones((n, 1), jnp.float32)
        aext = jnp.dot(a, jnp.concatenate([lp, ones_col], axis=-1),
                       preferred_element_type=jnp.float32)           # [N, 2]
        alp = aext[:, 0:1]
        aln = aext[:, 1:2] - alp                                     # A @ (1-lp)

        # KL(assign || uniform 0.5) per-node terms
        kl_terms = (lp * jnp.log(2.0 * lp + 1e-12)
                    + ln * jnp.log(2.0 * ln + 1e-12))                # [N, 1]

        # Fuse ALL axis-0 reductions into one ones-row MXU dot
        stacked = jnp.concatenate(
            [h3, lp * h3, lp, kl_terms,
             lp * alp, lp * aln, ln * alp, ln * aln], axis=-1)       # [N, 2H+6]
        ones_row = jnp.ones((1, n), jnp.float32)
        red = jnp.dot(ones_row, stacked, preferred_element_type=jnp.float32)

        graph_emb = red[:, 0:h] * inv_n                              # [1, H]
        sub_sum = red[:, h:2 * h]                                    # [1, H]
        lp_sum = red[:, 2 * h:2 * h + 1]
        kl = red[:, 2 * h + 1:2 * h + 2] * inv_n
        s00 = red[:, 2 * h + 2:2 * h + 3]
        s01 = red[:, 2 * h + 3:2 * h + 4]
        s10 = red[:, 2 * h + 4:2 * h + 5]
        s11 = red[:, 2 * h + 5:2 * h + 6]

        sub_emb = sub_sum * pl.reciprocal(lp_sum + 1e-8, approx=True)

        # connectivity penalty: || normalize(S^T A S) - I ||_F  with S = [lp, ln]
        fro = jnp.sqrt(s00 * s00 + s01 * s01 + s10 * s10 + s11 * s11) + 1e-8
        inv_fro = pl.reciprocal(fro, approx=True)
        n00 = s00 * inv_fro
        n01 = s01 * inv_fro
        n10 = s10 * inv_fro
        n11 = s11 * inv_fro
        pos_pen = jnp.sqrt((n00 - 1.0) * (n00 - 1.0) + n01 * n01
                           + n10 * n10 + (n11 - 1.0) * (n11 - 1.0))  # [1, 1]

        # bottleneck MLP on the subgraph embedding
        m1 = jnp.maximum(
            jnp.dot(sub_emb, p_ref[off_wm1:off_wm1 + h, :],
                    preferred_element_type=jnp.float32) + bm1, 0.0)  # [1, H]
        m2 = (jnp.dot(m1, p_ref[off_wm2:off_wm2 + h, :],
                      preferred_element_type=jnp.float32) + bm2)     # [1, H]

        # prototype distances: ||m||^2 - 2 m.P^T + ||p||^2 (row layout, no transpose)
        cross = jnp.dot(m2, p_ref[off_pt:off_pt + h, :],
                        preferred_element_type=jnp.float32)          # [1, H] (m valid)
        m2sq = jnp.sum(m2 * m2, axis=-1, keepdims=True)              # [1, 1]
        dist = jnp.maximum(m2sq - 2.0 * cross + pnorm, 0.0)          # [1, H] (m valid)
        sim = jnp.log((dist + 1.0) * pl.reciprocal(dist + 1e-4, approx=True))

        # classifier (wc block is zero-padded beyond [m, c] -> garbage lanes vanish)
        logits_full = jnp.dot(sim, p_ref[off_wc:off_wc + h, :],
                              preferred_element_type=jnp.float32) + bc
        logits = logits_full[:, 0:c]
        lmax = jnp.max(logits, axis=-1, keepdims=True)
        le = jnp.exp(logits - lmax)
        probs = le * pl.reciprocal(jnp.sum(le, axis=-1, keepdims=True), approx=True)

        # ---- lane-dense output: one [8,128] header store + one [N,128] store ----
        header = jnp.concatenate(
            [pad128(logits),
             pad128(probs),
             pad128(sim[:, 0:m]),
             pad128(dist[:, 0:m]),
             pad128(graph_emb),
             pad128(m1),
             pad128(m2),
             pad128(jnp.concatenate([kl, pos_pen], axis=-1))], axis=0)   # [8, 128]
        out_ref[0:8, :] = header
        out_ref[8:8 + n, :] = jnp.broadcast_to(lp, (n, 128))

    return kernel


# ---------------------------------------------------------------------------
# GnnNets.forward equivalent (batched, single pallas_call, jit-able)
# ---------------------------------------------------------------------------
def gnn_nets_forward(a, x, params, k=4):
    b, n, f_in = x.shape
    assert a.shape == (b, n, n)
    assert n % 8 == 0, "node count must be a multiple of 8 (pad the graph)"

    slab, scal, (f, h, m, c, krows) = pack_params(params)
    assert f == f_in
    out_rows = 8 + n

    kernel = _make_fused_kernel(n, f, h, m, c)

    # advisory cost estimate for XLA scheduling
    flops_g = (2 * n * n * (f + 2 * h + 2)
               + 2 * n * h * (f + 3 * h)
               + 2 * n * (2 * h + 6)
               + 8 * h * h)
    trans_g = n * h + 5 * n + 2 * h + c + 8
    bytes_g = 4 * (n * n + n * f + out_rows * 128)
    cost = pl.CostEstimate(flops=int(b * flops_g),
                           transcendentals=int(b * trans_g),
                           bytes_accessed=int(b * bytes_g + 4 * krows * h + 16))

    slab_out = pl.pallas_call(
        kernel,
        out_shape=jax.ShapeDtypeStruct((b, out_rows, 128), jnp.float32),
        grid=(b,),
        in_specs=[
            pl.BlockSpec(memory_space=pltpu.MemorySpace.SMEM),          # eps / ba2_diff
            pl.BlockSpec((None, n, n), lambda i: (i, 0, 0)),            # a[b]
            pl.BlockSpec((None, n, f), lambda i: (i, 0, 0)),            # x[b]
            pl.BlockSpec((krows, h), lambda i: (0, 0)),                 # weight slab (resident)
        ],
        out_specs=pl.BlockSpec((None, out_rows, 128), lambda i: (i, 0, 0)),
        compiler_params=pltpu.CompilerParams(
            dimension_semantics=("parallel",),      # shards batch across v7x's 2 TCs
            vmem_limit_bytes=32 * 1024 * 1024),
        cost_estimate=cost,
    )(scal, a, x, slab)

    logits = slab_out[:, 0, 0:c]
    probs = slab_out[:, 1, 0:c]
    sim_matrix = slab_out[:, 2, 0:m]
    min_distance = slab_out[:, 3, 0:m]
    graph_emb = slab_out[:, 4, 0:h]
    mlp1 = slab_out[:, 5, 0:h]
    mlp2 = slab_out[:, 6, 0:h]
    kl_loss = slab_out[:, 7, 0]
    pos_penalty = slab_out[:, 7, 1]
    lambda_pos = slab_out[:, 8:8 + n, 0]

    active_node_index = lambda_pos > 0.5        # boolean mask instead of ragged list
    order = jnp.argsort(-lambda_pos, axis=-1)
    topk_node_index = order[:, :k]
    bottomk_node_index = order[:, ::-1][:, :k]
    mlp_embeddings_list = [mlp1, mlp2]

    return (logits, probs, active_node_index, graph_emb, kl_loss, pos_penalty,
            sim_matrix, min_distance, topk_node_index, bottomk_node_index,
            mlp_embeddings_list)


# ---------------------------------------------------------------------------
# deterministic parameter construction
# ---------------------------------------------------------------------------
def make_params(key, input_dim, hidden_dim, num_prototypes, output_dim):
    ks = jax.random.split(key, 12)

    def lin(kk, fan_in, fan_out):
        scale = 1.0 / jnp.sqrt(jnp.asarray(fan_in, jnp.float32))
        return jax.random.uniform(kk, (fan_in, fan_out), jnp.float32, -scale, scale)

    return {
        "w1": lin(ks[0], input_dim, hidden_dim),  "b1": jnp.zeros((1, hidden_dim), jnp.float32),
        "w2": lin(ks[1], hidden_dim, hidden_dim), "b2": jnp.zeros((1, hidden_dim), jnp.float32),
        "w3": lin(ks[2], hidden_dim, hidden_dim), "b3": jnp.zeros((1, hidden_dim), jnp.float32),
        "wa1": lin(ks[3], hidden_dim, hidden_dim), "ba1": jnp.zeros((1, hidden_dim), jnp.float32),
        "wa2": lin(ks[4], hidden_dim, 2),          "ba2": jnp.zeros((1, 2), jnp.float32),
        "eps": jnp.zeros((3,), jnp.float32),       # per-layer GIN eps
        "wm1": lin(ks[5], hidden_dim, hidden_dim), "bm1": jnp.zeros((1, hidden_dim), jnp.float32),
        "wm2": lin(ks[6], hidden_dim, hidden_dim), "bm2": jnp.zeros((1, hidden_dim), jnp.float32),
        "prototypes": jax.random.uniform(ks[7], (num_prototypes, hidden_dim), jnp.float32),
        "wc": lin(ks[8], num_prototypes, output_dim),
        "bc": jnp.zeros((1, output_dim), jnp.float32),
    }


if __name__ == "__main__":
    B, N, INPUT_DIM, HIDDEN, NUM_PROTO, OUTPUT_DIM = 4, 16, 32, 32, 8, 4

    key = jax.random.PRNGKey(0)
    k_feat, k_adj, k_par = jax.random.split(key, 3)

    x = jax.random.normal(k_feat, (B, N, INPUT_DIM), jnp.float32)
    upper = (jax.random.uniform(k_adj, (B, N, N)) < 0.3).astype(jnp.float32)
    a = jnp.triu(upper, 1)
    a = a + jnp.swapaxes(a, -1, -2)     # symmetric binary adjacency, no self loops

    params = make_params(k_par, INPUT_DIM, HIDDEN, NUM_PROTO, OUTPUT_DIM)

    fwd = jax.jit(functools.partial(gnn_nets_forward, k=4))
    out = fwd(a, x, params)
    jax.block_until_ready(out)

    (logits, probs, active_mask, graph_emb, kl_loss, pos_penalty,
     sim_matrix, min_distance, topk_idx, bottomk_idx, mlp_list) = out

    assert logits.shape == (B, OUTPUT_DIM) and probs.shape == (B, OUTPUT_DIM)
    assert graph_emb.shape == (B, HIDDEN)
    assert sim_matrix.shape == (B, NUM_PROTO) and min_distance.shape == (B, NUM_PROTO)
    assert active_mask.shape == (B, N)
    assert topk_idx.shape == (B, 4) and bottomk_idx.shape == (B, 4)
    assert kl_loss.shape == (B,) and pos_penalty.shape == (B,)
    assert len(mlp_list) == 2 and mlp_list[0].shape == (B, HIDDEN)
    assert bool(jnp.all(jnp.isfinite(logits)))
    assert bool(jnp.all(jnp.isfinite(kl_loss))) and bool(jnp.all(jnp.isfinite(pos_penalty)))
    assert bool(jnp.all(jnp.abs(jnp.sum(probs, axis=-1) - 1.0) < 2e-3))

    print("KERNEL_OK")
</pallas_src>

<mosaic_0001>
module attributes {stable_mosaic.version = 11 : i64} {
  func.func @kernel(%arg0: i32, %arg1: memref<4xf32, #tpu.memory_space<smem>>, %arg2: memref<1x16x16xf32, #tpu.memory_space<vmem>>, %arg3: memref<1x16x32xf32, #tpu.memory_space<vmem>>, %arg4: memref<272x32xf32, #tpu.memory_space<vmem>>, %arg5: memref<1x24x128xf32, #tpu.memory_space<vmem>>) attributes {dimension_semantics = [#tpu.dimension_semantics<parallel>], iteration_bounds = array<i64: 4>, scalar_prefetch = 0 : i64, scratch_operands = 0 : i64, tpu.core_type = #tpu.core_type<tc>, window_params = [{transform_indices = @transform_0, window_bounds = array<i64: 4>}, {transform_indices = @transform_1, window_bounds = array<i64: 1, 16, 16>}, {transform_indices = @transform_2, window_bounds = array<i64: 1, 16, 32>}, {pipeline_mode = #tpu.pipeline_mode<synchronous>, transform_indices = @transform_3, window_bounds = array<i64: 272, 32>}, {transform_indices = @transform_4, window_bounds = array<i64: 1, 24, 128>}]} {
    %c0 = arith.constant 0 : index
    %c0_0 = arith.constant 0 : index
    %c0_1 = arith.constant 0 : index
    %0 = vector.load %arg2[%c0, %c0_0, %c0_1] : memref<1x16x16xf32, #tpu.memory_space<vmem>>, vector<1x16x16xf32>
    %1 = vector.shape_cast %0 : vector<1x16x16xf32> to vector<16x16xf32>
    %c0_2 = arith.constant 0 : index
    %c0_3 = arith.constant 0 : index
    %c0_4 = arith.constant 0 : index
    %2 = vector.load %arg3[%c0_2, %c0_3, %c0_4] : memref<1x16x32xf32, #tpu.memory_space<vmem>>, vector<1x16x32xf32>
    %3 = vector.shape_cast %2 : vector<1x16x32xf32> to vector<16x32xf32>
    %c0_5 = arith.constant 0 : index
    %4 = memref.load %arg1[%c0_5] : memref<4xf32, #tpu.memory_space<smem>>
    %c1 = arith.constant 1 : index
    %5 = memref.load %arg1[%c1] : memref<4xf32, #tpu.memory_space<smem>>
    %c2 = arith.constant 2 : index
    %6 = memref.load %arg1[%c2] : memref<4xf32, #tpu.memory_space<smem>>
    %c3 = arith.constant 3 : index
    %7 = memref.load %arg1[%c3] : memref<4xf32, #tpu.memory_space<smem>>
    %c256 = arith.constant 256 : index
    %c0_6 = arith.constant 0 : index
    %8 = vector.load %arg4[%c256, %c0_6] : memref<272x32xf32, #tpu.memory_space<vmem>>, vector<16x32xf32>
    %9 = vector.extract_strided_slice %8 {offsets = [0, 0], sizes = [1, 32], strides = [1, 1]} : vector<16x32xf32> to vector<1x32xf32>
    %10 = vector.extract_strided_slice %8 {offsets = [1, 0], sizes = [1, 32], strides = [1, 1]} : vector<16x32xf32> to vector<1x32xf32>
    %11 = vector.extract_strided_slice %8 {offsets = [2, 0], sizes = [1, 32], strides = [1, 1]} : vector<16x32xf32> to vector<1x32xf32>
    %12 = vector.extract_strided_slice %8 {offsets = [3, 0], sizes = [1, 32], strides = [1, 1]} : vector<16x32xf32> to vector<1x32xf32>
    %13 = vector.extract_strided_slice %8 {offsets = [4, 0], sizes = [1, 32], strides = [1, 1]} : vector<16x32xf32> to vector<1x32xf32>
    %14 = vector.extract_strided_slice %8 {offsets = [5, 0], sizes = [1, 32], strides = [1, 1]} : vector<16x32xf32> to vector<1x32xf32>
    %15 = vector.extract_strided_slice %8 {offsets = [6, 0], sizes = [1, 32], strides = [1, 1]} : vector<16x32xf32> to vector<1x32xf32>
    %16 = vector.extract_strided_slice %8 {offsets = [7, 0], sizes = [1, 32], strides = [1, 1]} : vector<16x32xf32> to vector<1x32xf32>
    %17 = vector.extract_strided_slice %8 {offsets = [8, 0], sizes = [1, 32], strides = [1, 1]} : vector<16x32xf32> to vector<1x32xf32>
    %c0_7 = arith.constant 0 : index
    %c0_8 = arith.constant 0 : index
    %18 = vector.load %arg4[%c0_7, %c0_8] : memref<272x32xf32, #tpu.memory_space<vmem>>, vector<32x32xf32>
    %cst = arith.constant dense<0.000000e+00> : vector<16x32xf32>
    %19 = tpu.matmul %1, %3, %cst {dimension_numbers = #tpu.dot_dimension_numbers<[1], [0], [0], [1], [0, 0, 1, 1], [], []>} : vector<16x16xf32>, vector<16x32xf32>, vector<16x32xf32> -> vector<16x32xf32>
    %cst_9 = arith.constant 1.000000e+00 : f32
    %20 = arith.addf %cst_9, %4 : f32
    %21 = vector.broadcast %20 : f32 to vector<16x32xf32>
    %22 = arith.mulf %21, %3 : vector<16x32xf32>
    %23 = arith.addf %19, %22 : vector<16x32xf32>
    %cst_10 = arith.constant dense<0.000000e+00> : vector<16x32xf32>
    %24 = tpu.matmul %23, %18, %cst_10 {dimension_numbers = #tpu.dot_dimension_numbers<[1], [0], [0], [1], [0, 0, 1, 1], [], []>} : vector<16x32xf32>, vector<32x32xf32>, vector<16x32xf32> -> vector<16x32xf32>
    %25 = vector.broadcast %9 : vector<1x32xf32> to vector<16x32xf32>
    %26 = arith.addf %24, %25 : vector<16x32xf32>
    %cst_11 = arith.constant 0.000000e+00 : f32
    %27 = vector.broadcast %cst_11 : f32 to vector<16x32xf32>
    %28 = arith.maximumf %26, %27 : vector<16x32xf32>
    %c32 = arith.constant 32 : index
    %c0_12 = arith.constant 0 : index
    %29 = vector.load %arg4[%c32, %c0_12] : memref<272x32xf32, #tpu.memory_space<vmem>>, vector<32x32xf32>
    %cst_13 = arith.constant dense<0.000000e+00> : vector<16x32xf32>
    %30 = tpu.matmul %1, %28, %cst_13 {dimension_numbers = #tpu.dot_dimension_numbers<[1], [0], [0], [1], [0, 0, 1, 1], [], []>} : vector<16x16xf32>, vector<16x32xf32>, vector<16x32xf32> -> vector<16x32xf32>
    %cst_14 = arith.constant 1.000000e+00 : f32
    %31 = arith.addf %cst_14, %5 : f32
    %32 = vector.broadcast %31 : f32 to vector<16x32xf32>
    %33 = arith.mulf %32, %28 : vector<16x32xf32>
    %34 = arith.addf %30, %33 : vector<16x32xf32>
    %cst_15 = arith.constant dense<0.000000e+00> : vector<16x32xf32>
    %35 = tpu.matmul %34, %29, %cst_15 {dimension_numbers = #tpu.dot_dimension_numbers<[1], [0], [0], [1], [0, 0, 1, 1], [], []>} : vector<16x32xf32>, vector<32x32xf32>, vector<16x32xf32> -> vector<16x32xf32>
    %36 = vector.broadcast %10 : vector<1x32xf32> to vector<16x32xf32>
    %37 = arith.addf %35, %36 : vector<16x32xf32>
    %cst_16 = arith.constant 0.000000e+00 : f32
    %38 = vector.broadcast %cst_16 : f32 to vector<16x32xf32>
    %39 = arith.maximumf %37, %38 : vector<16x32xf32>
    %c64 = arith.constant 64 : index
    %c0_17 = arith.constant 0 : index
    %40 = vector.load %arg4[%c64, %c0_17] : memref<272x32xf32, #tpu.memory_space<vmem>>, vector<32x32xf32>
    %cst_18 = arith.constant dense<0.000000e+00> : vector<16x32xf32>
    %41 = tpu.matmul %1, %39, %cst_18 {dimension_numbers = #tpu.dot_dimension_numbers<[1], [0], [0], [1], [0, 0, 1, 1], [], []>} : vector<16x16xf32>, vector<16x32xf32>, vector<16x32xf32> -> vector<16x32xf32>
    %cst_19 = arith.constant 1.000000e+00 : f32
    %42 = arith.addf %cst_19, %6 : f32
    %43 = vector.broadcast %42 : f32 to vector<16x32xf32>
    %44 = arith.mulf %43, %39 : vector<16x32xf32>
    %45 = arith.addf %41, %44 : vector<16x32xf32>
    %cst_20 = arith.constant dense<0.000000e+00> : vector<16x32xf32>
    %46 = tpu.matmul %45, %40, %cst_20 {dimension_numbers = #tpu.dot_dimension_numbers<[1], [0], [0], [1], [0, 0, 1, 1], [], []>} : vector<16x32xf32>, vector<32x32xf32>, vector<16x32xf32> -> vector<16x32xf32>
    %47 = vector.broadcast %11 : vector<1x32xf32> to vector<16x32xf32>
    %48 = arith.addf %46, %47 : vector<16x32xf32>
    %cst_21 = arith.constant 0.000000e+00 : f32
    %49 = vector.broadcast %cst_21 : f32 to vector<16x32xf32>
    %50 = arith.maximumf %48, %49 : vector<16x32xf32>
    %c96 = arith.constant 96 : index
    %c0_22 = arith.constant 0 : index
    %51 = vector.load %arg4[%c96, %c0_22] : memref<272x32xf32, #tpu.memory_space<vmem>>, vector<32x32xf32>
    %cst_23 = arith.constant dense<0.000000e+00> : vector<16x32xf32>
    %52 = tpu.matmul %50, %51, %cst_23 {dimension_numbers = #tpu.dot_dimension_numbers<[1], [0], [0], [1], [0, 0, 1, 1], [], []>} : vector<16x32xf32>, vector<32x32xf32>, vector<16x32xf32> -> vector<16x32xf32>
    %53 = vector.broadcast %12 : vector<1x32xf32> to vector<16x32xf32>
    %54 = arith.addf %52, %53 : vector<16x32xf32>
    %55 = math.tanh %54 : vector<16x32xf32>
    %56 = vector.broadcast %17 : vector<1x32xf32> to vector<16x32xf32>
    %57 = arith.mulf %55, %56 : vector<16x32xf32>
    %cst_24 = arith.constant dense<0.000000e+00> : vector<16xf32>
    %58 = vector.multi_reduction <add>, %57, %cst_24 [1] : vector<16x32xf32> to vector<16xf32>
    %59 = vector.shape_cast %58 : vector<16xf32> to vector<16x1xf32>
    %60 = vector.broadcast %7 : f32 to vector<16x1xf32>
    %61 = arith.addf %59, %60 : vector<16x1xf32>
    %cst_25 = arith.constant 5.000000e-01 : f32
    %62 = vector.broadcast %cst_25 : f32 to vector<16x1xf32>
    %63 = arith.mulf %62, %61 : vector<16x1xf32>
    %64 = math.tanh %63 : vector<16x1xf32>
    %cst_26 = arith.constant 1.000000e+00 : f32
    %65 = vector.broadcast %cst_26 : f32 to vector<16x1xf32>
    %66 = arith.addf %64, %65 : vector<16x1xf32>
    %cst_27 = arith.constant 5.000000e-01 : f32
    %67 = vector.broadcast %cst_27 : f32 to vector<16x1xf32>
    %68 = arith.mulf %67, %66 : vector<16x1xf32>
    %cst_28 = arith.constant 1.000000e+00 : f32
    %69 = vector.broadcast %cst_28 : f32 to vector<16x1xf32>
    %70 = arith.subf %69, %68 : vector<16x1xf32>
    %cst_29 = arith.constant 1.000000e+00 : f32
    %71 = vector.broadcast %cst_29 : f32 to vector<16x1xf32>
    %72 = tpu.concatenate %68, %71 in 1 : vector<16x1xf32>, vector<16x1xf32> -> vector<16x2xf32>
    %cst_30 = arith.constant dense<0.000000e+00> : vector<16x2xf32>
    %73 = tpu.matmul %1, %72, %cst_30 {dimension_numbers = #tpu.dot_dimension_numbers<[1], [0], [0], [1], [0, 0, 1, 1], [], []>} : vector<16x16xf32>, vector<16x2xf32>, vector<16x2xf32> -> vector<16x2xf32>
    %74 = vector.extract_strided_slice %73 {offsets = [0, 0], sizes = [16, 1], strides = [1, 1]} : vector<16x2xf32> to vector<16x1xf32>
    %75 = vector.extract_strided_slice %73 {offsets = [0, 1], sizes = [16, 1], strides = [1, 1]} : vector<16x2xf32> to vector<16x1xf32>
    %76 = arith.subf %75, %74 : vector<16x1xf32>
    %cst_31 = arith.constant 2.000000e+00 : f32
    %77 = vector.broadcast %cst_31 : f32 to vector<16x1xf32>
    %78 = arith.mulf %77, %68 : vector<16x1xf32>
    %cst_32 = arith.constant 9.99999996E-13 : f32
    %79 = vector.broadcast %cst_32 : f32 to vector<16x1xf32>
    %80 = arith.addf %78, %79 : vector<16x1xf32>
    %81 = math.log %80 : vector<16x1xf32>
    %82 = arith.mulf %68, %81 : vector<16x1xf32>
    %cst_33 = arith.constant 2.000000e+00 : f32
    %83 = vector.broadcast %cst_33 : f32 to vector<16x1xf32>
    %84 = arith.mulf %83, %70 : vector<16x1xf32>
    %cst_34 = arith.constant 9.99999996E-13 : f32
    %85 = vector.broadcast %cst_34 : f32 to vector<16x1xf32>
    %86 = arith.addf %84, %85 : vector<16x1xf32>
    %87 = math.log %86 : vector<16x1xf32>
    %88 = arith.mulf %70, %87 : vector<16x1xf32>
    %89 = arith.addf %82, %88 : vector<16x1xf32>
    %90 = vector.broadcast %68 : vector<16x1xf32> to vector<16x32xf32>
    %91 = arith.mulf %90, %50 : vector<16x32xf32>
    %92 = arith.mulf %68, %74 : vector<16x1xf32>
    %93 = arith.mulf %68, %76 : vector<16x1xf32>
    %94 = arith.mulf %70, %74 : vector<16x1xf32>
    %95 = arith.mulf %70, %76 : vector<16x1xf32>
    %96 = tpu.concatenate %50, %91, %68, %89, %92, %93, %94, %95 in 1 : vector<16x32xf32>, vector<16x32xf32>, vector<16x1xf32>, vector<16x1xf32>, vector<16x1xf32>, vector<16x1xf32>, vector<16x1xf32>, vector<16x1xf32> -> vector<16x70xf32>
    %cst_35 = arith.constant 1.000000e+00 : f32
    %97 = vector.broadcast %cst_35 : f32 to vector<1x16xf32>
    %cst_36 = arith.constant dense<0.000000e+00> : vector<1x70xf32>
    %98 = tpu.matmul %97, %96, %cst_36 {dimension_numbers = #tpu.dot_dimension_numbers<[1], [0], [0], [1], [0, 0, 1, 1], [], []>} : vector<1x16xf32>, vector<16x70xf32>, vector<1x70xf32> -> vector<1x70xf32>
    %99 = vector.extract_strided_slice %98 {offsets = [0, 0], sizes = [1, 32], strides = [1, 1]} : vector<1x70xf32> to vector<1x32xf32>
    %cst_37 = arith.constant 6.250000e-02 : f32
    %100 = vector.broadcast %cst_37 : f32 to vector<1x32xf32>
    %101 = arith.mulf %99, %100 : vector<1x32xf32>
    %102 = vector.extract_strided_slice %98 {offsets = [0, 32], sizes = [1, 32], strides = [1, 1]} : vector<1x70xf32> to vector<1x32xf32>
    %103 = vector.extract_strided_slice %98 {offsets = [0, 64], sizes = [1, 1], strides = [1, 1]} : vector<1x70xf32> to vector<1x1xf32>
    %104 = vector.extract_strided_slice %98 {offsets = [0, 65], sizes = [1, 1], strides = [1, 1]} : vector<1x70xf32> to vector<1x1xf32>
    %cst_38 = arith.constant 6.250000e-02 : f32
    %105 = vector.broadcast %cst_38 : f32 to vector<1x1xf32>
    %106 = arith.mulf %104, %105 : vector<1x1xf32>
    %107 = vector.extract_strided_slice %98 {offsets = [0, 66], sizes = [1, 1], strides = [1, 1]} : vector<1x70xf32> to vector<1x1xf32>
    %108 = vector.extract_strided_slice %98 {offsets = [0, 67], sizes = [1, 1], strides = [1, 1]} : vector<1x70xf32> to vector<1x1xf32>
    %109 = vector.extract_strided_slice %98 {offsets = [0, 68], sizes = [1, 1], strides = [1, 1]} : vector<1x70xf32> to vector<1x1xf32>
    %110 = vector.extract_strided_slice %98 {offsets = [0, 69], sizes = [1, 1], strides = [1, 1]} : vector<1x70xf32> to vector<1x1xf32>
    %cst_39 = arith.constant 9.99999993E-9 : f32
    %111 = vector.broadcast %cst_39 : f32 to vector<1x1xf32>
    %112 = arith.addf %103, %111 : vector<1x1xf32>
    %113 = tpu.reciprocal %112 {approx = true} : vector<1x1xf32> -> vector<1x1xf32>
    %114 = vector.broadcast %113 : vector<1x1xf32> to vector<1x32xf32>
    %115 = arith.mulf %102, %114 : vector<1x32xf32>
    %116 = arith.mulf %107, %107 : vector<1x1xf32>
    %117 = arith.mulf %108, %108 : vector<1x1xf32>
    %118 = arith.addf %116, %117 : vector<1x1xf32>
    %119 = arith.mulf %109, %109 : vector<1x1xf32>
    %120 = arith.addf %118, %119 : vector<1x1xf32>
    %121 = arith.mulf %110, %110 : vector<1x1xf32>
    %122 = arith.addf %120, %121 : vector<1x1xf32>
    %123 = math.sqrt %122 : vector<1x1xf32>
    %cst_40 = arith.constant 9.99999993E-9 : f32
    %124 = vector.broadcast %cst_40 : f32 to vector<1x1xf32>
    %125 = arith.addf %123, %124 : vector<1x1xf32>
    %126 = tpu.reciprocal %125 {approx = true} : vector<1x1xf32> -> vector<1x1xf32>
    %127 = arith.mulf %107, %126 : vector<1x1xf32>
    %128 = arith.mulf %108, %126 : vector<1x1xf32>
    %129 = arith.mulf %109, %126 : vector<1x1xf32>
    %130 = arith.mulf %110, %126 : vector<1x1xf32>
    %cst_41 = arith.constant 1.000000e+00 : f32
    %131 = vector.broadcast %cst_41 : f32 to vector<1x1xf32>
    %132 = arith.subf %127, %131 : vector<1x1xf32>
    %cst_42 = arith.constant 1.000000e+00 : f32
    %133 = vector.broadcast %cst_42 : f32 to vector<1x1xf32>
    %134 = arith.subf %127, %133 : vector<1x1xf32>
    %135 = arith.mulf %132, %134 : vector<1x1xf32>
    %136 = arith.mulf %128, %128 : vector<1x1xf32>
    %137 = arith.addf %135, %136 : vector<1x1xf32>
    %138 = arith.mulf %129, %129 : vector<1x1xf32>
    %139 = arith.addf %137, %138 : vector<1x1xf32>
    %cst_43 = arith.constant 1.000000e+00 : f32
    %140 = vector.broadcast %cst_43 : f32 to vector<1x1xf32>
    %141 = arith.subf %130, %140 : vector<1x1xf32>
    %cst_44 = arith.constant 1.000000e+00 : f32
    %142 = vector.broadcast %cst_44 : f32 to vector<1x1xf32>
    %143 = arith.subf %130, %142 : vector<1x1xf32>
    %144 = arith.mulf %141, %143 : vector<1x1xf32>
    %145 = arith.addf %139, %144 : vector<1x1xf32>
    %146 = math.sqrt %145 : vector<1x1xf32>
    %c128 = arith.constant 128 : index
    %c0_45 = arith.constant 0 : index
    %147 = vector.load %arg4[%c128, %c0_45] : memref<272x32xf32, #tpu.memory_space<vmem>>, vector<32x32xf32>
    %cst_46 = arith.constant dense<0.000000e+00> : vector<1x32xf32>
    %148 = tpu.matmul %115, %147, %cst_46 {dimension_numbers = #tpu.dot_dimension_numbers<[1], [0], [0], [1], [0, 0, 1, 1], [], []>} : vector<1x32xf32>, vector<32x32xf32>, vector<1x32xf32> -> vector<1x32xf32>
    %149 = arith.addf %148, %13 : vector<1x32xf32>
    %cst_47 = arith.constant 0.000000e+00 : f32
    %150 = vector.broadcast %cst_47 : f32 to vector<1x32xf32>
    %151 = arith.maximumf %149, %150 : vector<1x32xf32>
    %c160 = arith.constant 160 : index
    %c0_48 = arith.constant 0 : index
    %152 = vector.load %arg4[%c160, %c0_48] : memref<272x32xf32, #tpu.memory_space<vmem>>, vector<32x32xf32>
    %cst_49 = arith.constant dense<0.000000e+00> : vector<1x32xf32>
    %153 = tpu.matmul %151, %152, %cst_49 {dimension_numbers = #tpu.dot_dimension_numbers<[1], [0], [0], [1], [0, 0, 1, 1], [], []>} : vector<1x32xf32>, vector<32x32xf32>, vector<1x32xf32> -> vector<1x32xf32>
    %154 = arith.addf %153, %14 : vector<1x32xf32>
    %c192 = arith.constant 192 : index
    %c0_50 = arith.constant 0 : index
    %155 = vector.load %arg4[%c192, %c0_50] : memref<272x32xf32, #tpu.memory_space<vmem>>, vector<32x32xf32>
    %cst_51 = arith.constant dense<0.000000e+00> : vector<1x32xf32>
    %156 = tpu.matmul %154, %155, %cst_51 {dimension_numbers = #tpu.dot_dimension_numbers<[1], [0], [0], [1], [0, 0, 1, 1], [], []>} : vector<1x32xf32>, vector<32x32xf32>, vector<1x32xf32> -> vector<1x32xf32>
    %157 = arith.mulf %154, %154 : vector<1x32xf32>
    %cst_52 = arith.constant dense<0.000000e+00> : vector<1xf32>
    %158 = vector.multi_reduction <add>, %157, %cst_52 [1] : vector<1x32xf32> to vector<1xf32>
    %159 = vector.shape_cast %158 : vector<1xf32> to vector<1x1xf32>
    %cst_53 = arith.constant 2.000000e+00 : f32
    %160 = vector.broadcast %cst_53 : f32 to vector<1x32xf32>
    %161 = arith.mulf %160, %156 : vector<1x32xf32>
    %162 = vector.broadcast %159 : vector<1x1xf32> to vector<1x32xf32>
    %163 = arith.subf %162, %161 : vector<1x32xf32>
    %164 = arith.addf %163, %16 : vector<1x32xf32>
    %cst_54 = arith.constant 0.000000e+00 : f32
    %165 = vector.broadcast %cst_54 : f32 to vector<1x32xf32>
    %166 = arith.maximumf %164, %165 : vector<1x32xf32>
    %cst_55 = arith.constant 1.000000e+00 : f32
    %167 = vector.broadcast %cst_55 : f32 to vector<1x32xf32>
    %168 = arith.addf %166, %167 : vector<1x32xf32>
    %cst_56 = arith.constant 9.99999974E-5 : f32
    %169 = vector.broadcast %cst_56 : f32 to vector<1x32xf32>
    %170 = arith.addf %166, %169 : vector<1x32xf32>
    %171 = tpu.reciprocal %170 {approx = true} : vector<1x32xf32> -> vector<1x32xf32>
    %172 = arith.mulf %168, %171 : vector<1x32xf32>
    %173 = math.log %172 : vector<1x32xf32>
    %c224 = arith.constant 224 : index
    %c0_57 = arith.constant 0 : index
    %174 = vector.load %arg4[%c224, %c0_57] : memref<272x32xf32, #tpu.memory_space<vmem>>, vector<32x32xf32>
    %cst_58 = arith.constant dense<0.000000e+00> : vector<1x32xf32>
    %175 = tpu.matmul %173, %174, %cst_58 {dimension_numbers = #tpu.dot_dimension_numbers<[1], [0], [0], [1], [0, 0, 1, 1], [], []>} : vector<1x32xf32>, vector<32x32xf32>, vector<1x32xf32> -> vector<1x32xf32>
    %176 = arith.addf %175, %15 : vector<1x32xf32>
    %177 = vector.extract_strided_slice %176 {offsets = [0, 0], sizes = [1, 4], strides = [1, 1]} : vector<1x32xf32> to vector<1x4xf32>
    %cst_59 = arith.constant dense<0xFF800000> : vector<1xf32>
    %178 = vector.multi_reduction <maximumf>, %177, %cst_59 [1] : vector<1x4xf32> to vector<1xf32>
    %179 = vector.shape_cast %178 : vector<1xf32> to vector<1x1xf32>
    %180 = vector.broadcast %179 : vector<1x1xf32> to vector<1x4xf32>
    %181 = arith.subf %177, %180 : vector<1x4xf32>
    %182 = math.exp %181 : vector<1x4xf32>
    %cst_60 = arith.constant dense<0.000000e+00> : vector<1xf32>
    %183 = vector.multi_reduction <add>, %182, %cst_60 [1] : vector<1x4xf32> to vector<1xf32>
    %184 = vector.shape_cast %183 : vector<1xf32> to vector<1x1xf32>
    %185 = tpu.reciprocal %184 {approx = true} : vector<1x1xf32> -> vector<1x1xf32>
    %186 = vector.broadcast %185 : vector<1x1xf32> to vector<1x4xf32>
    %187 = arith.mulf %182, %186 : vector<1x4xf32>
    %cst_61 = arith.constant 0.000000e+00 : f32
    %188 = vector.broadcast %cst_61 : f32 to vector<1x124xf32>
    %189 = tpu.concatenate %177, %188 in 1 : vector<1x4xf32>, vector<1x124xf32> -> vector<1x128xf32>
    %cst_62 = arith.constant 0.000000e+00 : f32
    %190 = vector.broadcast %cst_62 : f32 to vector<1x124xf32>
    %191 = tpu.concatenate %187, %190 in 1 : vector<1x4xf32>, vector<1x124xf32> -> vector<1x128xf32>
    %192 = vector.extract_strided_slice %173 {offsets = [0, 0], sizes = [1, 8], strides = [1, 1]} : vector<1x32xf32> to vector<1x8xf32>
    %cst_63 = arith.constant 0.000000e+00 : f32
    %193 = vector.broadcast %cst_63 : f32 to vector<1x120xf32>
    %194 = tpu.concatenate %192, %193 in 1 : vector<1x8xf32>, vector<1x120xf32> -> vector<1x128xf32>
    %195 = vector.extract_strided_slice %166 {offsets = [0, 0], sizes = [1, 8], strides = [1, 1]} : vector<1x32xf32> to vector<1x8xf32>
    %cst_64 = arith.constant 0.000000e+00 : f32
    %196 = vector.broadcast %cst_64 : f32 to vector<1x120xf32>
    %197 = tpu.concatenate %195, %196 in 1 : vector<1x8xf32>, vector<1x120xf32> -> vector<1x128xf32>
    %cst_65 = arith.constant 0.000000e+00 : f32
    %198 = vector.broadcast %cst_65 : f32 to vector<1x96xf32>
    %199 = tpu.concatenate %101, %198 in 1 : vector<1x32xf32>, vector<1x96xf32> -> vector<1x128xf32>
    %cst_66 = arith.constant 0.000000e+00 : f32
    %200 = vector.broadcast %cst_66 : f32 to vector<1x96xf32>
    %201 = tpu.concatenate %151, %200 in 1 : vector<1x32xf32>, vector<1x96xf32> -> vector<1x128xf32>
    %cst_67 = arith.constant 0.000000e+00 : f32
    %202 = vector.broadcast %cst_67 : f32 to vector<1x96xf32>
    %203 = tpu.concatenate %154, %202 in 1 : vector<1x32xf32>, vector<1x96xf32> -> vector<1x128xf32>
    %204 = tpu.concatenate %106, %146 in 1 : vector<1x1xf32>, vector<1x1xf32> -> vector<1x2xf32>
    %cst_68 = arith.constant 0.000000e+00 : f32
    %205 = vector.broadcast %cst_68 : f32 to vector<1x126xf32>
    %206 = tpu.concatenate %204, %205 in 1 : vector<1x2xf32>, vector<1x126xf32> -> vector<1x128xf32>
    %207 = tpu.concatenate %189, %191, %194, %197, %199, %201, %203, %206 in 0 : vector<1x128xf32>, vector<1x128xf32>, vector<1x128xf32>, vector<1x128xf32>, vector<1x128xf32>, vector<1x128xf32>, vector<1x128xf32>, vector<1x128xf32> -> vector<8x128xf32>
    %c0_69 = arith.constant 0 : index
    %c0_70 = arith.constant 0 : index
    %c0_71 = arith.constant 0 : index
    %208 = vector.load %arg5[%c0_69, %c0_70, %c0_71] : memref<1x24x128xf32, #tpu.memory_space<vmem>>, vector<1x8x128xf32>
    %209 = vector.shape_cast %208 : vector<1x8x128xf32> to vector<8x128xf32>
    %210 = vector.shape_cast %207 : vector<8x128xf32> to vector<1x8x128xf32>
    tpu.vector_store %arg5[%c0_69, %c0_70, %c0_71], %210 {strides = array<i32>} : memref<1x24x128xf32, #tpu.memory_space<vmem>>, vector<1x8x128xf32>,
    %211 = vector.shape_cast %68 : vector<16x1xf32> to vector<16x1xf32>
    %212 = vector.broadcast %211 : vector<16x1xf32> to vector<16x128xf32>
    %c0_72 = arith.constant 0 : index
    %c8 = arith.constant 8 : index
    %c0_73 = arith.constant 0 : index
    %213 = vector.load %arg5[%c0_72, %c8, %c0_73] : memref<1x24x128xf32, #tpu.memory_space<vmem>>, vector<1x16x128xf32>
    %214 = vector.shape_cast %213 : vector<1x16x128xf32> to vector<16x128xf32>
    %215 = vector.shape_cast %212 : vector<16x128xf32> to vector<1x16x128xf32>
    tpu.vector_store %arg5[%c0_72, %c8, %c0_73], %215 {strides = array<i32>} : memref<1x24x128xf32, #tpu.memory_space<vmem>>, vector<1x16x128xf32>,
    return
  }
  func.func @transform_0(%arg0: i32) -> i32 {
    %c0_i32 = arith.constant 0 : i32
    %c0_i32_0 = arith.constant 0 : i32
    return %c0_i32 : i32
  }
  func.func @transform_1(%arg0: i32) -> (i32, i32, i32) {
    %c0_i32 = arith.constant 0 : i32
    %c0_i32_0 = arith.constant 0 : i32
    %c0_i32_1 = arith.constant 0 : i32
    return %arg0, %c0_i32, %c0_i32_0 : i32, i32, i32
  }
  func.func @transform_2(%arg0: i32) -> (i32, i32, i32) {
    %c0_i32 = arith.constant 0 : i32
    %c0_i32_0 = arith.constant 0 : i32
    %c0_i32_1 = arith.constant 0 : i32
    return %arg0, %c0_i32, %c0_i32_0 : i32, i32, i32
  }
  func.func @transform_3(%arg0: i32) -> (i32, i32) {
    %c0_i32 = arith.constant 0 : i32
    %c0_i32_0 = arith.constant 0 : i32
    %c0_i32_1 = arith.constant 0 : i32
    return %c0_i32, %c0_i32_0 : i32, i32
  }
  func.func @transform_4(%arg0: i32) -> (i32, i32, i32) {
    %c0_i32 = arith.constant 0 : i32
    %c0_i32_0 = arith.constant 0 : i32
    %c0_i32_1 = arith.constant 0 : i32
    return %arg0, %c0_i32, %c0_i32_0 : i32, i32, i32
  }
}

</mosaic_0001>

<bundles_post_ra>
// kernel: reverse
= control target key start
LH: loop header
LB: loop body
LE: loop exit
PB: predicated region body
PF: predicated region fallthrough
CT: control target
= control target key end

     0   :  { %v43_v1 = vld [vmem:[#allocation1] sm:$0xf]  ;;  %v53_v4 = vlaneseq  ;;  %s123_s0 = inlined_call_operand.vmem [shape: s32[4,4], index: 0, kind: input, shape index: {}]   ;;  %s124_s1 = inlined_call_operand.vmem [shape: s32[4,4], index: 1, kind: output, shape index: {}]  }
   0x1   :  { %v19_v0 = vld [vmem:[%s123_s0] sm:$0xf]  ;;  %44 = vst [vmem:[#allocation0] sm:$0xf] %v43_v1 }
   0x2   :  { %20 = vst [vmem:[#allocation1 + $0x4] sm:$0xf] %v19_v0  ;;  %v54_v6 = vshrl.u32 %v53_v4, 7 }
   0x4   :  { %vm55_vm0 = vcmp.lt.s32.totalorder %v54_v6, 4 }
   0x8   :  { %v46_v3 = vld [vmem:[#allocation0 + $0x7] ss:$-1 sm:$0xff] }
   0x9   :  { %v40_v2 = vld [vmem:[#allocation1 + $0x4] sm:$0xf]  ;;  %v47_v5 = vrot.slane %v46_v3, 4 }
   0xa   :  { %42 = vst [vmem:[#allocation0 + $0x8] sm:$0xf] %v40_v2 }
   0xb   :  { %48 = vst [vmem:[#allocation2] sm:$0xff] %v47_v5 }
  0x11   :  { %v51_v7 = vld [vmem:[#allocation0 + $0xf] ss:$-1 sm:$0xff] }
  0x12   :  { %v52_v8 = vrot.slane %v51_v7, 4 }
  0x14   :  { %56 = vst.msk [vmem:[#allocation2] sm:$0xff] %vm55_vm0, %v52_v8 }
  0x1b   :  { %v61_v9 = vld [vmem:[#allocation2] sm:$0xf] }
  0x1c   :  { %64 = vst [vmem:[#allocation3] sm:$0xf] %v61_v9 }
  0x23   :  { %v81_v10 = vld [vmem:[#allocation3] sm:$0xf] }
  0x24   :  { %82 = vst [vmem:[%s124_s1] sm:$0xf] %v81_v10 }

// kernel: gnn_nets_forward.1
= control target key start
LH: loop header
LB: loop body
LE: loop exit
PB: predicated region body
PF: predicated region fallthrough
CT: control target
= control target key end

     0   :  { %9 = vsyncpa [#allocation3], 0  ;;  %s2052_s15 = smov 0   ;;  %s2373_s0 = inlined_call_operand.vmem [shape: f32[4], index: 0, kind: input, shape index: {}]   ;;  %s2374_s1 = inlined_call_operand.vmem [shape: f32[4,16,16], index: 1, kind: input, shape index: {}]   ;;  %s2375_s2 = inlined_call_operand.vmem [shape: f32[4,16,32], index: 2, kind: input, shape index: {}]   ;;  %s2376_s3 = inlined_call_operand.vmem [shape: f32[272,32], index: 3, kind: input, shape index: {}]   ;;  %s2377_s4 = inlined_call_operand.vmem [shape: f32[4,24,128], index: 4, kind: output, shape index: {}]  }
   0x1 LB: > { %s1687_s16 = sadd.s32 4294967295, %s2009_s15   ;;  %p1689_p0 = scmp.ge.s32.totalorder %s2009_s15, 1  ;;  %s2009_s15 = sphi %s2052_s15, %s15_s15  }
   0x2   : > { %p140_p1 = scmp.lt.s32.totalorder %s2009_s15, 5  ;;  %s153_s19 = sshll.u32 %s2373_s0, 4  ;;  %s154_s19 = int_to_ptr.vmem [resolvable:$true] %s153_s19 }
   0x3   : > { %p1924_p3 = scmp.eq.s32.totalorder %s1687_s16, 0  ;;  %s1984_s21 = scalar_lea.vmem %s154_s19, 16 }
   0x4   : > { %p2063_p2 = pnand %p1689_p0, %p140_p1  ;;  %p1985_p6 = scmp.ne.s32.totalorder %s154_s19, %s1984_s21 }
   0x5   : > { %p1992_p10 = scmp.lt.s32.totalorder %s154_s19, %s154_s19  ;;  %p1993_p11 = scmp.lt.s32.totalorder %s1984_s21, %s1984_s21 }
   0x6   : > { %p1920_p4 = pneg %p2063_p2 }
   0x7   : > { %p1994_p12 = por %p1993_p11, %p1992_p10 }
   0x8   : > { %p1921_p5 = pnand %p1924_p3, %p1920_p4 }
   0xa   : > { %p1986_p7 = pneg %p1921_p5 }
   0xc   : > { %p1987_p8 = pnand %p1986_p7, %p1985_p6 }
   0xe   : > { %p1988_p9 = pneg %p1987_p8 }
  0x10   : > { %p1995_p13 = pnand %p1994_p12, %p1988_p9 }
  0x12   : > { %1998 = shalt.err (!%p1995_p13)
}
  0x13   : > { %s2011_s22 = smov [#allocation2]   ;;  %185 = sbr.rel (%p2063_p2) target bundleno = 3645 (0xe3d), region = 36 }
  0x14   : > { %1923 = dma.vmem_to_smem (!%p1921_p5), %s154_s19, 16, %s2011_s22, [#allocation3]  }
  0x18   : > { %2004 = dma.done.wait (%p1924_p3), [#allocation3], 16  }
  0x19   : > { %2006 = vsyncadd (%p1924_p3), [#allocation3], 4294967280 }
  0x1a   : > { %191 = sfence }
  0x1b   : > { %p217_p0 = scmp.lt.s32.totalorder %s1687_s16, 3  ;;  %v245_v0 = vld [vmem:[%s2376_s3 + $0x18] sm:$0xff]  ;;  %vm250_vm0 = vcmask 130048   ;;  %v244_v5 = vld [vmem:[%s2376_s3 + $0x10] sm:$0xff]  ;;  %v243_v6 = vld [vmem:[%s2376_s3 + $0x8] sm:$0xff]  ;;  %s236_s12 = sld [smem:[#allocation2]]  ;;  %v332_v15 = vlaneseq }
  0x1c   : > { %1799 = vmatprep.subr.mxu1 %v245_v0  ;;  %v242_v7 = vld [vmem:[%s2376_s3] sm:$0xff]  ;;  %vm336_vm1 = vcmask 261120   ;;  %v423_v26 = vld [vmem:[%s2376_s3 + $0x38] sm:$0xff]  ;;  %v422_v27 = vld [vmem:[%s2376_s3 + $0x30] sm:$0xff]  ;;  %s1699_s26 = sld [smem:[#allocation2 + $0x1]]  ;;  %vm876_vm2 = vcmask 7168  }
  0x1d   : > { %s2380_s16 = smov (!%p217_p0, %s1687_s16), 3  ;;  %1800 = vmatpush3.msra.mxu1 %v245_v0  ;;  %v2109_v16 = vshrl.u32 %v332_v15, 7  ;;  %v2115_v18 = vld [vmem:[%s2376_s3 + $0x100] sm:$0xff]  ;;  %v421_v28 = vld [vmem:[%s2376_s3 + $0x28] sm:$0xff]  ;;  %v593_v45 = vld [vmem:[%s2376_s3 + $0x58] sm:$0xff]  ;;  %s1700_s10 = sld [smem:[#allocation2 + $0x2]] }
  0x1e   : > { %s1727_s25 = sshll.u32 %s2380_s16, 4  ;;  %1801 = vmatprep.subr.mxu1 %v244_v5  ;;  %v420_v29 = vld [vmem:[%s2376_s3 + $0x20] sm:$0xff]  ;;  %v592_v46 = vld [vmem:[%s2376_s3 + $0x50] sm:$0xff]  ;;  %v591_v47 = vld [vmem:[%s2376_s3 + $0x48] sm:$0xff]  ;;  %s1701_s24 = sld [smem:[#allocation2 + $0x3]]  ;;  %vm2017_vm3 = vmmov 0  }
  0x1f   : > { %s226_s28 = scalar_lea.vmem %s2375_s2, %s1727_s25  ;;  %s221_s5 = scalar_lea.vmem %s2374_s1, %s1727_s25  ;;  %1802 = vmatpush3.msra.mxu1 %v244_v5  ;;  %v334_v17 = vsub.s32 0, %v2109_v16  ;;  %v505_v37 = vsub.s32 1, %v2109_v16  ;;  %v590_v48 = vld [vmem:[%s2376_s3 + $0x40] sm:$0xff]  ;;  %v763_v56 = vld [vmem:[%s2376_s3 + $0x78] sm:$0xff]  ;;  %v762_v57 = vld [vmem:[%s2376_s3 + $0x70] sm:$0xff]  ;;  %v675_v60 = vsub.s32 2, %v2109_v16 }
  0x20   : > { %v235_v1 = vld [vmem:[%s226_s28 + $0x8] sm:$0xff]  ;;  %v234_v2 = vld [vmem:[%s226_s28] sm:$0xff]  ;;  %1803 = vmatprep.subr.mxu1 %v243_v6  ;;  %v766_v5 = vsub.s32 3, %v2109_v16  ;;  %s1915_s25 = smul.u32 24, %s2380_s16  ;;  %s2012_s16 = smov 32   ;;  %vm1038_vm4 = vcmask 523264  }
  0x21   : > { %v2086_v3 = vld [vmem:[%s221_s5] sm:$0xff]  ;;  %1792 = vmatprep.subr.mxu0 %v235_v1  ;;  %v2090_v4 = vld [vmem:[%s221_s5 + $0x8] sm:$0xff]  ;;  %1804 = vmatpush3.msra.mxu1 %v243_v6  ;;  %s246_s13 = sadd.f32 1.0, %s236_s12  ;;  %v335_v19 = vrot.slane %v2115_v18, %v334_v17  ;;  %v506_v38 = vrot.slane %v2115_v18, %v505_v37  ;;  %v676_v61 = vrot.slane %v2115_v18, %v675_v60  ;;  %s2013_s29 = smov 1   ;;  %vm1041_vm5 = vcmask 531456  }
  0x22   : > { %1796 = vmatprep.mubr.msk.f32.mxu0 %vm250_vm0, %v2086_v3  ;;  %1793 = vmatpush3.msra.mxu0 %v235_v1  ;;  %s424_s27 = sadd.f32 1.0, %s1699_s26  ;;  %v761_v58 = vld [vmem:[%s2376_s3 + $0x68] sm:$0xff]  ;;  %v760_v59 = vld [vmem:[%s2376_s3 + $0x60] sm:$0xff]  ;;  %v767_v6 = vrot.slane %v2115_v18, %v766_v5  ;;  %s2191_s28 = scalar_lea.vmem %s2377_s4, %s1915_s25  ;;  %vm1044_vm6 = vcmask 539648   ;;  %vm1047_vm7 = vcmask 547840   ;;  %vm1050_vm8 = vcmask 556032  }
  0x23   : > { %1794 = vmatprep.subr.mxu0 %v234_v2  ;;  %1805 = vmatprep.subr.mxu1 %v242_v7  ;;  %v247_v8 = vstv %s246_s13  ;;  %s594_s11 = sadd.f32 1.0, %s1700_s10  ;;  %s2014_s30 = smov 66   ;;  %vm1053_vm9 = vcmask 564224   ;;  %vm1443_vm12 = vcmask 253952   ;;  %vm1538_vm13 = vcmask 24576  }
  0x24   : > { %1795 = vmatpush3.msra.mxu0 %v234_v2  ;;  %1806 = vmatpush3.msra.mxu1 %v242_v7  ;;  %v248_v9 = vmul.f32 %v247_v8, %v234_v2  ;;  %v249_v10 = vmul.f32 %v247_v8, %v235_v1  ;;  %v425_v30 = vstv %s424_s27  ;;  %s2015_s5 = smov 68   ;;  %s2020_s14 = smov 96  }
  0x25   : > { %1797 = vmatmul.mubr.msk.f32.vlgmr.msra.gmra.mxu0 %vm250_vm0, %v2090_v4  ;;  %v595_v49 = vstv %s594_s11  ;;  %s2021_s17 = smov 127   ;;  %s2022_s18 = smov 126  }
  0x26   : > { %1814 = vmatprep.mubr.msk.f32.mxu0 %vm250_vm0, %v2086_v3  ;;  %s2023_s19 = smov 125   ;;  %s2024_s22 = smov 2  }
  0x27   : > { %s2025_s23 = smov 3  }
  0xe5   : > { %v1798_v11 = vpop.f32.mrf.mxu0 }
  0xe6   : > { %v329_v14 = vadd.f32 %v1798_v11, %v249_v10  ;;  %v241_v11 = vld [vmem:[%s2376_s3 + $0x108] sm:$0xff] }
  0xe7   : > { %v323_v12 = vpop.f32.mrf.mxu0 }
  0xe8   : > { %v324_v13 = vadd.f32 %v323_v12, %v248_v9  ;;  %v854_v12 = vrot.slane %v241_v11, %v334_v17 }
  0xea   : > { %1807 = vmatprep.mubr.msk.f32.mxu1 %vm336_vm1, %v324_v13 }
  0xeb   : > { %1808 = vmatmul.mubr.msk.f32.vlgmr.msra.gmra.mxu1 %vm336_vm1, %v329_v14 }
  0xec   : > { %1832 = vmatprep.mubr.msk.f32.mxu1 %vm250_vm0, %v2086_v3 }
 0x1ab   : > { %v1809_v20 = vpop.f32.mrf.mxu1 }
 0x1ac   : > { %v415_v21 = vadd.f32 %v1809_v20, %v335_v19 }
 0x1ad   : > { %v409_v22 = vpop.f32.mrf.mxu1 }
 0x1ae   : > { %v419_v23 = vmax.f32 %v415_v21, 0.0  ;;  %v410_v24 = vadd.f32 %v409_v22, %v335_v19  ;;  %v863_v22 = vstv %s1701_s24 }
 0x1b0   : > { %v418_v25 = vmax.f32 %v410_v24, 0.0  ;;  %1810 = vmatprep.subr.mxu0 %v419_v23  ;;  %v427_v33 = vmul.f32 %v425_v30, %v419_v23 }
 0x1b1   : > { %1811 = vmatpush3.msra.mxu0 %v419_v23 }
 0x1b2   : > { %1812 = vmatprep.subr.mxu0 %v418_v25  ;;  %v426_v32 = vmul.f32 %v425_v30, %v418_v25 }
 0x1b3   : > { %1813 = vmatpush3.msra.mxu0 %v418_v25 }
 0x1b4   : > { %1815 = vmatmul.mubr.msk.f32.vlgmr.msra.gmra.mxu0 %vm250_vm0, %v2090_v4  ;;  %1817 = vmatprep.subr.mxu0 %v423_v26 }
 0x1b5   : > { %1818 = vmatpush3.msra.mxu0 %v423_v26 }
 0x1b6   : > { %1819 = vmatprep.subr.mxu0 %v422_v27 }
 0x1b7   : > { %1820 = vmatpush3.msra.mxu0 %v422_v27 }
 0x1b8   : > { %1821 = vmatprep.subr.mxu0 %v421_v28 }
 0x1b9   : > { %1822 = vmatpush3.msra.mxu0 %v421_v28 }
 0x1ba   : > { %1823 = vmatprep.subr.mxu0 %v420_v29 }
 0x1bb   : > { %1824 = vmatpush3.msra.mxu0 %v420_v29 }
 0x1bc   : > { %1846 = vmatprep.subr.mxu0 %v763_v56 }
 0x274   : > { %v1816_v31 = vpop.f32.mrf.mxu0 }
 0x275   : > { %v500_v36 = vadd.f32 %v1816_v31, %v427_v33 }
 0x276   : > { %v494_v34 = vpop.f32.mrf.mxu0 }
 0x277   : > { %v495_v35 = vadd.f32 %v494_v34, %v426_v32 }
 0x279   : > { %1825 = vmatprep.mubr.msk.f32.mxu0 %vm336_vm1, %v495_v35 }
 0x27a   : > { %1826 = vmatmul.mubr.msk.f32.vlgmr.msra.gmra.mxu0 %vm336_vm1, %v500_v36 }
 0x27b   : > { %1847 = vmatpush3.msra.mxu0 %v763_v56 }
 0x27c   : > { %1848 = vmatprep.subr.mxu0 %v762_v57 }
 0x27d   : > { %1849 = vmatpush3.msra.mxu0 %v762_v57 }
 0x27e   : > { %1850 = vmatprep.subr.mxu0 %v761_v58 }
 0x27f   : > { %1851 = vmatpush3.msra.mxu0 %v761_v58 }
 0x280   : > { %1852 = vmatprep.subr.mxu0 %v760_v59 }
 0x281   : > { %1853 = vmatpush3.msra.mxu0 %v760_v59 }
 0x33a   : > { %v1827_v39 = vpop.f32.mrf.mxu0 }
 0x33b   : > { %v585_v40 = vadd.f32 %v1827_v39, %v506_v38 }
 0x33c   : > { %v579_v41 = vpop.f32.mrf.mxu0 }
 0x33d   : > { %v589_v42 = vmax.f32 %v585_v40, 0.0  ;;  %v580_v43 = vadd.f32 %v579_v41, %v506_v38 }
 0x33f   : > { %v588_v44 = vmax.f32 %v580_v43, 0.0  ;;  %1828 = vmatprep.subr.mxu1 %v589_v42  ;;  %v597_v52 = vmul.f32 %v595_v49, %v589_v42 }
 0x340   : > { %1829 = vmatpush3.msra.mxu1 %v589_v42  ;;  %v2016_v42 = vmov 0.0  }
 0x341   : > { %1830 = vmatprep.subr.mxu1 %v588_v44  ;;  %v596_v51 = vmul.f32 %v595_v49, %v588_v44  ;;  %1864 = vmatprep.subr.mxu0 %v2016_v42 }
 0x342   : > { %1831 = vmatpush3.msra.mxu1 %v588_v44 }
 0x343   : > { %1833 = vmatmul.mubr.msk.f32.vlgmr.msra.gmra.mxu1 %vm250_vm0, %v2090_v4  ;;  %1835 = vmatprep.subr.mxu1 %v593_v45 }
 0x344   : > { %1836 = vmatpush3.msra.mxu1 %v593_v45 }
 0x345   : > { %1837 = vmatprep.subr.mxu1 %v592_v46 }
 0x346   : > { %1838 = vmatpush3.msra.mxu1 %v592_v46 }
 0x347   : > { %1839 = vmatprep.subr.mxu1 %v591_v47 }
 0x348   : > { %1840 = vmatpush3.msra.mxu1 %v591_v47 }
 0x349   : > { %1841 = vmatprep.subr.mxu1 %v590_v48 }
 0x34a   : > { %1842 = vmatpush3.msra.mxu1 %v590_v48 }
 0x403   : > { %v1834_v50 = vpop.f32.mrf.mxu1 }
 0x404   : > { %v670_v55 = vadd.f32 %v1834_v50, %v597_v52 }
 0x405   : > { %v664_v53 = vpop.f32.mrf.mxu1 }
 0x406   : > { %v665_v54 = vadd.f32 %v664_v53, %v596_v51 }
 0x408   : > { %1843 = vmatprep.mubr.msk.f32.mxu1 %vm336_vm1, %v665_v54 }
 0x409   : > { %1844 = vmatmul.mubr.msk.f32.vlgmr.msra.gmra.mxu1 %vm336_vm1, %v670_v55 }
 0x40a   : > { %1861 = vmatprep.mubr.msk.f32.mxu1 %vm250_vm0, %v2086_v3 }
 0x4c9   : > { %v1845_v62 = vpop.f32.mrf.mxu1 }
 0x4ca   : > { %v755_v63 = vadd.f32 %v1845_v62, %v676_v61 }
 0x4cb   : > { %v749_v0 = vpop.f32.mrf.mxu1 }
 0x4cc   : > { %v750_v1 = vadd.f32 %v749_v0, %v676_v61  ;;  %v2172_v3 = vmax.f32 %v755_v63, 0.0 }
 0x4ce   : > { %v2170_v2 = vmax.f32 %v750_v1, 0.0 }
 0x4d0   : > { %1854 = vmatprep.mubr.msk.f32.mxu0 %vm336_vm1, %v2170_v2 }
 0x4d1   : > { %1855 = vmatmul.mubr.msk.f32.vlgmr.msra.gmra.mxu0 %vm336_vm1, %v2172_v3 }
 0x4d2   : > { %1868 = vmatprep.mubr.msk.f32.mxu0 %vm2017_vm3, %v2016_v42 }
 0x591   : > { %v1856_v7 = vpop.f32.mrf.mxu0 }
 0x592   : > { %v846_v8 = vadd.f32 %v1856_v7, %v767_v6 }
 0x593   : > { %v840_v9 = vpop.f32.mrf.mxu0 }
 0x594   : > { %1952 = vtanh.f32 %v846_v8  ;;  %v841_v10 = vadd.f32 %v840_v9, %v767_v6 }
 0x596   : > { %1954 = vtanh.f32 %v841_v10 }
 0x5a1   : > { %v1953_v13 = vpop.eup %1952 }
 0x5a2   : > { %v856_v14 = vmul.f32 %v1953_v13, %v854_v12 }
 0x5a3   : > { %v1955_v15 = vpop.eup %1954 }
 0x5a4   : > { %v860_v19 = vsel %vm336_vm1, %v856_v14, 0.0  ;;  %v855_v20 = vmul.f32 %v1955_v15, %v854_v12 }
 0x5a5   : > { %861 = vadd.xlane.f32.xlu0 %v860_v19 }
 0x5a6   : > { %v857_v21 = vsel %vm336_vm1, %v855_v20, 0.0 }
 0x5a9   : > { %858 = vadd.xlane.f32.xlu0 %v857_v21 }
 0x62e   : > { %v862_v23 = vpop.xlane.xlu0 %861 }
 0x62f   : > { %v865_v24 = vadd.f32 %v863_v22, %v862_v23 }
 0x631   : > { %v867_v25 = vmul.f32 0.5, %v865_v24 }
 0x632   : > { %v859_v26 = vpop.xlane.xlu0 %858 }
 0x633   : > { %1956 = vtanh.f32 %v867_v25  ;;  %v864_v16 = vadd.f32 %v863_v22, %v859_v26 }
 0x635   : > { %v866_v17 = vmul.f32 0.5, %v864_v16 }
 0x637   : > { %1958 = vtanh.f32 %v866_v17 }
 0x640   : > { %v1957_v27 = vpop.eup %1956 }
 0x641   : > { %v871_v28 = vadd.f32 1.0, %v1957_v27 }
 0x643   : > { %v2193_v29 = vmul.f32 0.5, %v871_v28 }
 0x644   : > { %v1959_v30 = vpop.eup %1958 }
 0x645   : > { %1607 = vst [vmem:[%s2191_s28 + $0x10] sm:$0xff] %v2193_v29  ;;  %v870_v31 = vadd.f32 1.0, %v1959_v30  ;;  %v878_v32 = vsel %vm876_vm2, %v2193_v29, 1.0  ;;  %v987_v33 = vmul.f32 %v2193_v29, %v2172_v3  ;;  %v875_v40 = vsub.f32 1.0, %v2193_v29 }
 0x646   : > { %1857 = vmatprep.subr.mxu1 %v878_v32  ;;  %v965_v54 = vmul.f32 2.0, %v2193_v29 }
 0x647   : > { %v2201_v34 = vmul.f32 0.5, %v870_v31  ;;  %1858 = vmatpush3.msra.mxu1 %v878_v32  ;;  %1000 = vrot.lane.b32.xlu0 %v987_v33, %s2012_s16  ;;  %v975_v53 = vmul.f32 2.0, %v875_v40 }
 0x648   : > { %v967_v56 = vadd.f32 1e-12, %v965_v54 }
 0x649   : > { %1606 = vst [vmem:[%s2191_s28 + $0x8] sm:$0xff] %v2201_v34  ;;  %v877_v35 = vsel %vm876_vm2, %v2201_v34, 1.0  ;;  %v986_v38 = vmul.f32 %v2201_v34, %v2170_v2  ;;  %v874_v48 = vsub.f32 1.0, %v2201_v34  ;;  %v977_v55 = vadd.f32 1e-12, %v975_v53 }
 0x64a   : > { %1859 = vmatprep.subr.mxu1 %v877_v35  ;;  %v964_v58 = vmul.f32 2.0, %v2201_v34 }
 0x64b   : > { %1860 = vmatpush3.msra.mxu1 %v877_v35  ;;  %v974_v57 = vmul.f32 2.0, %v874_v48  ;;  %1960 = vlog2.f32 %v977_v55 }
 0x64c   : > { %1862 = vmatmul.mubr.msk.f32.vlgmr.msra.gmra.mxu1 %vm250_vm0, %v2090_v4  ;;  %1871 = vmatprep.subr.mxu1 %v2016_v42  ;;  %1962 = vlog2.f32 %v967_v56  ;;  %v966_v61 = vadd.f32 1e-12, %v964_v58 }
 0x64d   : > { %1879 = vmatprep.mubr.msk.f32.mxu1 %vm2017_vm3, %v2016_v42  ;;  %v976_v59 = vadd.f32 1e-12, %v974_v57 }
 0x64f   : > { %1964 = vlog2.f32 %v976_v59 }
 0x650   : > { %1966 = vlog2.f32 %v966_v61 }
 0x658   : > { %v1961_v63 = vpop.eup %1960 }
 0x659   : > { %v1963_v0 = vpop.eup %1962  ;;  %v981_v1 = vmul.f32 0.6931472, %v1961_v63 }
 0x65a   : > { %v971_v7 = vmul.f32 0.6931472, %v1963_v0  ;;  %v1289_v0 = vld [vmem:[%s2376_s3 + $0xb8] sm:$0xff] }
 0x65b   : > { %v983_v10 = vmul.f32 %v981_v1, %v875_v40  ;;  %v1288_v1 = vld [vmem:[%s2376_s3 + $0xb0] sm:$0xff] }
 0x65c   : > { %v1965_v8 = vpop.eup %1964  ;;  %v973_v12 = vmul.f32 %v971_v7, %v2193_v29  ;;  %v1368_v7 = vld [vmem:[%s2376_s3 + $0xd8] sm:$0xff] }
 0x65d   : > { %v1967_v11 = vpop.eup %1966  ;;  %v979_v15 = vmul.f32 0.6931472, %v1965_v8  ;;  %v1367_v8 = vld [vmem:[%s2376_s3 + $0xd0] sm:$0xff] }
 0x65e   : > { %v985_v19 = vadd.f32 %v983_v10, %v973_v12  ;;  %v969_v20 = vmul.f32 0.6931472, %v1967_v11 }
 0x65f   : > { %v982_v23 = vmul.f32 %v979_v15, %v874_v48  ;;  %v1365_v15 = vld [vmem:[%s2376_s3 + $0xc0] sm:$0xff] }
 0x660   : > { %v972_v26 = vmul.f32 %v969_v20, %v2201_v34 }
 0x6b9   : > { %v1001_v5 = vpop.permute.xlu0 %1000 }
 0x6ba   : > { %v1037_v9 = vsel %vm336_vm1, %v2172_v3, %v1001_v5  ;;  %v1287_v5 = vld [vmem:[%s2376_s3 + $0xa8] sm:$0xff] }
 0x6bb   : > { %v1040_v13 = vsel %vm1038_vm4, %v1037_v9, %v2193_v29  ;;  %v1211_v9 = vrot.slane %v2115_v18, 4 }
 0x6bc   : > { %v1043_v21 = vsel %vm1041_vm5, %v1040_v13, %v985_v19  ;;  %v1290_v19 = vrot.slane %v2115_v18, 5 }
 0x70c   : > { %v1863_v36 = vpop.f32.mrf.mxu1 }
 0x70d   : > { %958 = vrot.lane.b32.xlu1 %v1863_v36, %s2013_s29  ;;  %v989_v39 = vmul.f32 %v1863_v36, %v2193_v29  ;;  %v993_v41 = vmul.f32 %v1863_v36, %v875_v40 }
 0x70e   : > { %v945_v37 = vpop.f32.mrf.mxu1 }
 0x70f   : > { %v988_v4 = vmul.f32 %v945_v37, %v2201_v34  ;;  %v992_v52 = vmul.f32 %v945_v37, %v874_v48 }
 0x711   : > { %956 = vrot.lane.b32.xlu1 %v945_v37, %s2013_s29 }
 0x715   : > { %998 = vrot.lane.b32.xlu1 %v986_v38, %s2012_s16  ;;  %v2019_v38 = vmov 64  }
 0x716   : > { %1950 = vset.pattern.permute.xlu1 %v2019_v38  ;;  %1951 = vset.pattern.permute.xlu0 %v2019_v38 }
 0x719   : > { %1008 = vrot.lane.b32.xlu1 %v989_v39, %s2014_s30 }
 0x71d   : > { %1024 = vrot.lane.b32.xlu1 %v993_v41, %s2015_s5 }
 0x721   : > { %1006 = vrot.lane.b32.xlu1 %v988_v4, %s2014_s30 }
 0x77f   : > { %v959_v43 = vpop.permute.xlu1 %958 }
 0x780   : > { %v963_v44 = vsub.f32 %v1863_v36, %v959_v43  ;;  %v1206_v43 = vld [vmem:[%s2376_s3 + $0x98] sm:$0xff] }
 0x781   : > { %1872 = vmatpush3.msra.mxu1 %v1206_v43 }
 0x782   : > { %v991_v45 = vmul.f32 %v963_v44, %v2193_v29  ;;  %v995_v46 = vmul.f32 %v963_v44, %v875_v40  ;;  %v984_v29 = vadd.f32 %v982_v23, %v972_v26  ;;  %v1205_v44 = vld [vmem:[%s2376_s3 + $0x90] sm:$0xff]  ;;  %1873 = vmatprep.subr.mxu1 %v2016_v42 }
 0x783   : > { %v957_v47 = vpop.permute.xlu1 %956  ;;  %1874 = vmatpush3.msra.mxu1 %v1205_v44 }
 0x784   : > { %v962_v49 = vsub.f32 %v945_v37, %v957_v47  ;;  %1032 = vrot.lane.b32.xlu0 %v995_v46, %s2015_s5  ;;  %1016 = vrot.lane.b32.xlu1 %v991_v45, %s2014_s30  ;;  %v1204_v45 = vld [vmem:[%s2376_s3 + $0x88] sm:$0xff]  ;;  %v1203_v46 = vld [vmem:[%s2376_s3 + $0x80] sm:$0xff] }
 0x785   : > { %1875 = vmatprep.subr.mxu1 %v2016_v42 }
 0x786   : > { %v990_v50 = vmul.f32 %v962_v49, %v2201_v34  ;;  %v994_v51 = vmul.f32 %v962_v49, %v874_v48  ;;  %1876 = vmatpush3.msra.mxu1 %v1204_v45  ;;  %v1463_v45 = vrot.slane %v2115_v18, 6 }
 0x787   : > { %v999_v60 = vpop.permute.xlu1 %998  ;;  %1877 = vmatprep.subr.mxu1 %v2016_v42 }
 0x788   : > { %1014 = vrot.lane.b32.xlu1 %v990_v50, %s2014_s30  ;;  %1030 = vrot.lane.b32.xlu0 %v994_v51, %s2015_s5  ;;  %v1036_v3 = vsel %vm336_vm1, %v2170_v2, %v999_v60 }
 0x789   : > { %v1039_v27 = vsel %vm1038_vm4, %v1036_v3, %v2201_v34  ;;  %v2018_v34 = vmov 1.0   ;;  %1878 = vmatpush3.msra.mxu1 %v1203_v46  ;;  %vm1591_vm4 = vcmask 1040384  }
 0x78a   : > { %v1042_v2 = vsel %vm1041_vm5, %v1039_v27, %v984_v29  ;;  %1893 = vmatprep.subr.mxu1 %v2016_v42  ;;  %v1461_v29 = vld [vmem:[%s2376_s3 + $0xf0] sm:$0xff]  ;;  %vm1568_vm5 = vcmask 15360  }
 0x78b   : > { %v1009_v62 = vpop.permute.xlu1 %1008 }
 0x78c   : > { %1022 = vrot.lane.b32.xlu1 %v992_v52, %s2015_s5  ;;  %v1046_v22 = vsel %vm1044_vm6, %v1043_v21, %v1009_v62 }
 0x78f   : > { %v1025_v6 = vpop.permute.xlu1 %1024 }
 0x793   : > { %v1007_v14 = vpop.permute.xlu1 %1006 }
 0x794   : > { %v1045_v31 = vsel %vm1044_vm6, %v1042_v2, %v1007_v14  ;;  %v1366_v14 = vld [vmem:[%s2376_s3 + $0xc8] sm:$0xff]  ;;  %v1459_v2 = vld [vmem:[%s2376_s3 + $0xe0] sm:$0xff]  ;;  %vm1593_vm6 = vcmask 1041408  }
 0x7f6   : > { %v1017_v24 = vpop.permute.xlu1 %1016  ;;  %v1033_v17 = vpop.permute.xlu0 %1032 }
 0x7f7   : > { %v1049_v25 = vsel %vm1047_vm7, %v1046_v22, %v1017_v24 }
 0x7f8   : > { %v1052_v16 = vsel %vm1050_vm8, %v1049_v25, %v1025_v6  ;;  %v1286_v6 = vld [vmem:[%s2376_s3 + $0xa0] sm:$0xff] }
 0x7f9   : > { %v1055_v28 = vsel %vm1053_vm9, %v1052_v16, %v1033_v17 }
 0x7fa   : > { %v1015_v30 = vpop.permute.xlu1 %1014  ;;  %1865 = vmatpush3.msra.mxu0 %v1055_v28  ;;  %v1031_v35 = vpop.permute.xlu0 %1030  ;;  %v1462_v28 = vld [vmem:[%s2376_s3 + $0xf8] sm:$0xff] }
 0x7fb   : > { %1866 = vmatprep.subr.mxu0 %v2016_v42  ;;  %v1048_v32 = vsel %vm1047_vm7, %v1045_v31, %v1015_v30  ;;  %v1460_v30 = vld [vmem:[%s2376_s3 + $0xe8] sm:$0xff]  ;;  %vm1595_vm7 = vcmask 1042432  }
 0x7fe   : > { %v1023_v33 = vpop.permute.xlu1 %1022 }
 0x7ff   : > { %v1051_v36 = vsel %vm1050_vm8, %v1048_v32, %v1023_v33  ;;  %v1449_v33 = vrot.slane %v2115_v18, 7  ;;  %vm1597_vm8 = vcmask 1043456  }
 0x800   : > { %v1054_v37 = vsel %vm1053_vm9, %v1051_v36, %v1031_v35  ;;  %vm1599_vm9 = vcmask 1044480  }
 0x801   : > { %1867 = vmatpush3.msra.mxu0 %v1054_v37 }
 0x802   : > { %1869 = vmatmul.mubr.msk.f32.vlgmr.msra.gmra.mxu0 %vm250_vm0, %v2018_v34  ;;  %1882 = vmatprep.subr.mxu0 %v2016_v42  ;;  %vm1553_vm0 = vcmask 64512  }
 0x803   : > { %1890 = vmatprep.mubr.msk.f32.mxu0 %vm2017_vm3, %v2016_v42  ;;  %1883 = vmatpush3.msra.mxu0 %v1289_v0 }
 0x804   : > { %1884 = vmatprep.subr.mxu0 %v2016_v42 }
 0x805   : > { %1885 = vmatpush3.msra.mxu0 %v1288_v1 }
 0x806   : > { %1886 = vmatprep.subr.mxu0 %v2016_v42 }
 0x807   : > { %1887 = vmatpush3.msra.mxu0 %v1287_v5 }
 0x808   : > { %1888 = vmatprep.subr.mxu0 %v2016_v42 }
 0x809   : > { %1889 = vmatpush3.msra.mxu0 %v1286_v6 }
 0x80a   : > { %1904 = vmatprep.subr.mxu0 %v2016_v42 }
 0x8c2   : > { %v2252_v39 = vpop.f32.mrf.mxu0 }
 0x8c3   : > { %v1130_v40 = vadd.f32 1e-08, %v2252_v39  ;;  %v1138_v49 = vmul.f32 %v2252_v39, %v2252_v39 }
 0x8c4   : > { %v1870_v41 = vpop.f32.mrf.mxu0 }
 0x8c5   : > { %1968 = vrcp.f32 %v1130_v40 }
 0x8d2   : > { %v1969_v4 = vpop.eup %1968 }
 0x8d3   : > { %1134 = vperm.xlu1 %1950, %v1969_v4  }
 0x94e   : > { %v1135_v47 = vpop.permute.xlu1 %1134 }
 0x94f   : > { %v1137_v48 = vmul.f32 %v1135_v47, %v2252_v39 }
 0x951   : > { %1208 = vrot.lane.b32.xlu0 %v1137_v48, %s2020_s14 }
 0x955   : > { %1140 = vrot.lane.b32.xlu0 %v1138_v49, %s2021_s17 }
 0x959   : > { %1144 = vrot.lane.b32.xlu0 %v1138_v49, %s2022_s18 }
 0x95d   : > { %1148 = vrot.lane.b32.xlu0 %v1138_v49, %s2023_s19 }
 0x9c3   : > { %v1209_v50 = vpop.permute.xlu0 %1208 }
 0x9c4   : > { %1880 = vmatmul.mubr.msk.f32.vlgmr.msra.gmra.mxu1 %vm336_vm1, %v1209_v50 }
 0x9c5   : > { %1901 = vmatprep.mubr.msk.f32.mxu1 %vm2017_vm3, %v2016_v42  ;;  %1894 = vmatpush3.msra.mxu1 %v1368_v7 }
 0x9c6   : > { %1895 = vmatprep.subr.mxu1 %v2016_v42 }
 0x9c7   : > { %v1141_v51 = vpop.permute.xlu0 %1140  ;;  %1896 = vmatpush3.msra.mxu1 %v1367_v8 }
 0x9c8   : > { %v1143_v53 = vadd.f32 %v1141_v51, %v1138_v49  ;;  %1897 = vmatprep.subr.mxu1 %v2016_v42 }
 0x9c9   : > { %1898 = vmatpush3.msra.mxu1 %v1366_v14 }
 0x9ca   : > { %1899 = vmatprep.subr.mxu1 %v2016_v42 }
 0x9cb   : > { %v1145_v52 = vpop.permute.xlu0 %1144  ;;  %1900 = vmatpush3.msra.mxu1 %v1365_v15 }
 0x9cc   : > { %v1147_v54 = vadd.f32 %v1145_v52, %v1143_v53 }
 0x9cf   : > { %v1149_v55 = vpop.permute.xlu0 %1148 }
 0x9d0   : > { %v1151_v56 = vadd.f32 %v1149_v55, %v1147_v54  ;;  %v1129_v54 = vmul.f32 0.0625, %v2252_v39 }
 0x9d2   : > { %1970 = vrsqrt.f32 %v1151_v56  ;;  %vm1154_vm10 = vcmp.eq.f32.partialorder %v1151_v56, inf  ;;  %v1157_v59 = vand.u32 2147483648, %v1151_v56  ;;  %vm1156_vm11 = vcmp.eq.f32.partialorder %v1151_v56, 0.0 }
 0x9df   : > { %v1971_v57 = vpop.eup %1970 }
 0x9e0   : > { %v1153_v58 = vmul.f32 %v1971_v57, %v1151_v56 }
 0x9e2   : > { %v1155_v60 = vsel %vm1154_vm10, %v1151_v56, %v1153_v58  ;;  %vm1603_vm10 = vcmask 1046528  }
 0x9e3   : > { %v1158_v61 = vsel %vm1156_vm11, %v1157_v59, %v1155_v60 }
 0x9e4   : > { %v1159_v62 = vadd.f32 1e-08, %v1158_v61 }
 0x9e6   : > { %1972 = vrcp.f32 %v1159_v62 }
 0x9f3   : > { %v2280_v63 = vpop.eup %1972 }
 0x9f4   : > { %1163 = vrot.lane.b32.xlu0 %v2280_v63, %s2013_s29  ;;  %v1161_v18 = vmul.f32 %v2280_v63, %v2252_v39 }
 0x9f6   : > { %v1719_v56 = vadd.f32 -1.0, %v1161_v18 }
 0x9f8   : > { %1167 = vrot.lane.b32.xlu0 %v2280_v63, %s2024_s22  ;;  %v1176_v57 = vmul.f32 %v1719_v56, %v1719_v56 }
 0x9fc   : > { %1171 = vrot.lane.b32.xlu0 %v2280_v63, %s2025_s23  ;;  %s2026_s23 = smov 63  }
 0xa66   : > { %v1164_v24 = vpop.permute.xlu0 %1163 }
 0xa67   : > { %v1166_v25 = vmul.f32 %v1164_v24, %v2252_v39 }
 0xa69   : > { %v1177_v16 = vmul.f32 %v1166_v25, %v1166_v25 }
 0xa6a   : > { %v1168_v26 = vpop.permute.xlu0 %1167 }
 0xa6b   : > { %v1170_v17 = vmul.f32 %v1168_v26, %v2252_v39 }
 0xa6d   : > { %v1183_v27 = vmul.f32 %v1170_v17, %v1170_v17 }
 0xa6e   : > { %v1172_v50 = vpop.permute.xlu0 %1171 }
 0xa6f   : > { %v1174_v51 = vmul.f32 %v1172_v50, %v2252_v39 }
 0xa71   : > { %v1720_v52 = vadd.f32 -1.0, %v1174_v51 }
 0xa73   : > { %v1190_v53 = vmul.f32 %v1720_v52, %v1720_v52 }
 0xa84   : > { %v1281_v10 = vpop.f32.mrf.mxu1 }
 0xa85   : > { %v2311_v11 = vadd.f32 %v1281_v10, %v1211_v9 }
 0xa86   : > { %v1881_v12 = vpop.f32.mrf.mxu1 }
 0xa87   : > { %v1285_v13 = vmax.f32 %v2311_v11, 0.0 }
 0xa89   : > { %1891 = vmatmul.mubr.msk.f32.vlgmr.msra.gmra.mxu0 %vm336_vm1, %v1285_v13 }
 0xa8a   : > { %1912 = vmatprep.mubr.msk.f32.mxu0 %vm2017_vm3, %v2016_v42  ;;  %1905 = vmatpush3.msra.mxu0 %v1462_v28  ;;  %vm1550_vm3 = vcmask 31744  }
 0xa8b   : > { %1906 = vmatprep.subr.mxu0 %v2016_v42 }
 0xa8c   : > { %1907 = vmatpush3.msra.mxu0 %v1461_v29 }
 0xa8d   : > { %1908 = vmatprep.subr.mxu0 %v2016_v42 }
 0xa8e   : > { %1909 = vmatpush3.msra.mxu0 %v1460_v30 }
 0xa8f   : > { %1910 = vmatprep.subr.mxu0 %v2016_v42 }
 0xa90   : > { %1911 = vmatpush3.msra.mxu0 %v1459_v2 }
 0xb49   : > { %v1361_v20 = vpop.f32.mrf.mxu0 }
 0xb4a   : > { %v2327_v21 = vadd.f32 %v1361_v20, %v1290_v19 }
 0xb4b   : > { %v1892_v3 = vpop.f32.mrf.mxu0 }
 0xb4c   : > { %1902 = vmatmul.mubr.msk.f32.vlgmr.msra.gmra.mxu1 %vm336_vm1, %v2327_v21  ;;  %v1442_v22 = vmul.f32 %v2327_v21, %v2327_v21  ;;  %v1558_v28 = vsel %vm336_vm1, %v2327_v21, 0.0 }
 0xb4d   : > { %v1586_v11 = vrot.slane %v1558_v28, 2 }
 0xb4e   : > { %v1444_v23 = vsel %vm1443_vm12, %v1442_v22, 0.0 }
 0xb4f   : > { %1445 = vadd.xlane.f32.xlu1 %v1444_v23  ;;  %v1556_v23 = vsel %vm336_vm1, %v1129_v54, 0.0 }
 0xb50   : > { %v1580_v2 = vrot.slane %v1556_v23, 4 }
 0xb60   : > { %1179 = vrot.lane.b32.xlu1 %v1177_v16, %s2021_s17  ;;  %v1557_v16 = vsel %vm336_vm1, %v1285_v13, 0.0 }
 0xb64   : > { %1185 = vrot.lane.b32.xlu1 %v1183_v27, %s2022_s18 }
 0xbd8   : > { %v1446_v35 = vpop.xlane.xlu1 %1445 }
 0xbdc   : > { %v1180_v55 = vpop.permute.xlu1 %1179 }
 0xbdd   : > { %v1182_v60 = vadd.f32 %v1180_v55, %v1176_v57 }
 0xbe0   : > { %v1186_v58 = vpop.permute.xlu1 %1185 }
 0xbe1   : > { %v1188_v62 = vadd.f32 %v1186_v58, %v1182_v60 }
 0xc0c   : > { %v1438_v31 = vpop.f32.mrf.mxu1 }
 0xc0d   : > { %v1447_v32 = vmul.f32 2.0, %v1438_v31 }
 0xc0e   : > { %v1903_v36 = vpop.f32.mrf.mxu1 }
 0xc0f   : > { %v1448_v37 = vsub.f32 %v1446_v35, %v1447_v32 }
 0xc11   : > { %v1451_v34 = vadd.f32 %v1449_v33, %v1448_v37  ;;  %v1583_v33 = vrot.slane %v1557_v16, 3 }
 0xc13   : > { %v1452_v38 = vmax.f32 %v1451_v34, 0.0 }
 0xc15   : > { %v1454_v40 = vadd.f32 0.0001, %v1452_v38  ;;  %v1453_v41 = vadd.f32 1.0, %v1452_v38  ;;  %v1555_v22 = vsel %vm1553_vm0, %v1452_v38, 0.0 }
 0xc16   : > { %v1577_v29 = vrot.slane %v1555_v22, 5 }
 0xc17   : > { %1974 = vrcp.f32 %v1454_v40 }
 0xc24   : > { %v1975_v4 = vpop.eup %1974 }
 0xc25   : > { %v1456_v43 = vmul.f32 %v1975_v4, %v1453_v41 }
 0xc27   : > { %1976 = vlog2.f32 %v1456_v43 }
 0xc34   : > { %v1977_v42 = vpop.eup %1976 }
 0xc35   : > { %v1458_v44 = vmul.f32 0.6931472, %v1977_v42 }
 0xc37   : > { %1913 = vmatmul.mubr.msk.f32.vlgmr.msra.gmra.mxu0 %vm336_vm1, %v1458_v44  ;;  %v1554_v3 = vsel %vm1553_vm0, %v1458_v44, 0.0 }
 0xc38   : > { %v1574_v17 = vrot.slane %v1554_v3, 6 }
 0xcf7   : > { %v1534_v46 = vpop.f32.mrf.mxu0 }
 0xcf8   : > { %v1535_v47 = vadd.f32 %v1534_v46, %v1463_v45 }
 0xcf9   : > { %v1914_v48 = vpop.f32.mrf.mxu0 }
 0xcfa   : > { %v1539_v49 = vsel %vm1538_vm13, %v1535_v47, -inf  ;;  %v1551_v27 = vsel %vm1550_vm3, %v1535_v47, 0.0 }
 0xcfb   : > { %1540 = vmax.xlane.f32.xlu0 %v1539_v49 }
 0xd11   : > { %1192 = vrot.lane.b32.xlu0 %v1190_v53, %s2023_s19 }
 0xd15   : > { %1560 = vrot.lane.b32.xlu0 %v1129_v54, %s2026_s23 }
 0xd84   : > { %v1541_v59 = vpop.xlane.xlu0 %1540 }
 0xd85   : > { %v1542_v61 = vsub.f32 %v1535_v47, %v1541_v59 }
 0xd87   : > { %v1543_v0 = vmul.f32 1.442695, %v1542_v61 }
 0xd88   : > { %v1193_v1 = vpop.permute.xlu0 %1192 }
 0xd89   : > { %1978 = vpow2.f32 %v1543_v0  ;;  %v1195_v5 = vadd.f32 %v1193_v1, %v1188_v62 }
 0xd8b   : > { %1980 = vrsqrt.f32 %v1195_v5  ;;  %vm1198_vm14 = vcmp.eq.f32.partialorder %v1195_v5, inf  ;;  %v1201_v39 = vand.u32 2147483648, %v1195_v5  ;;  %vm1200_vm15 = vcmp.eq.f32.partialorder %v1195_v5, 0.0 }
 0xd8c   : > { %v1561_v14 = vpop.permute.xlu0 %1560 }
 0xd96   : > { %v1979_v6 = vpop.eup %1978 }
 0xd97   : > { %v1545_v7 = vsel %vm1538_vm13, %v1979_v6, 0.0 }
 0xd98   : > { %v1981_v8 = vpop.eup %1980  ;;  %1546 = vadd.xlane.f32.xlu1 %v1545_v7 }
 0xd99   : > { %v1197_v9 = vmul.f32 %v1981_v8, %v1195_v5 }
 0xd9b   : > { %v1199_v63 = vsel %vm1198_vm14, %v1195_v5, %v1197_v9 }
 0xd9c   : > { %v1202_v10 = vsel %vm1200_vm15, %v1201_v39, %v1199_v63 }
 0xd9d   : > { %1564 = vrot.lane.b32.xlu0 %v1202_v10, %s2026_s23 }
 0xe0f   : > { %v1565_v19 = vpop.permute.xlu0 %1564 }
 0xe10   : > { %v1567_v25 = vsel %vm876_vm2, %v1561_v14, %v1565_v19  ;;  %vm1601_vm2 = vcmask 1045504  }
 0xe11   : > { %v1569_v31 = vsel %vm1568_vm5, %v1567_v25, 0.0 }
 0xe12   : > { %v1589_v36 = vrot.slane %v1569_v31, 1 }
 0xe21   : > { %v1547_v12 = vpop.xlane.xlu1 %1546 }
 0xe22   : > { %1982 = vrcp.f32 %v1547_v12 }
 0xe2f   : > { %v1983_v15 = vpop.eup %1982 }
 0xe30   : > { %v1549_v20 = vmul.f32 %v1983_v15, %v1979_v6 }
 0xe32   : > { %v1552_v24 = vsel %vm1550_vm3, %v1549_v20, 0.0 }
 0xe33   : > { %v1571_v26 = vrot.slane %v1552_v24, 7 }
 0xe35   : > { %v1592_v30 = vsel %vm1591_vm4, %v1551_v27, %v1571_v26 }
 0xe36   : > { %v1594_v32 = vsel %vm1593_vm6, %v1592_v30, %v1574_v17 }
 0xe37   : > { %v1596_v35 = vsel %vm1595_vm7, %v1594_v32, %v1577_v29 }
 0xe38   : > { %v1598_v13 = vsel %vm1597_vm8, %v1596_v35, %v1580_v2 }
 0xe39   : > { %v1600_v37 = vsel %vm1599_vm9, %v1598_v13, %v1583_v33 }
 0xe3a   : > { %v1602_v34 = vsel %vm1601_vm2, %v1600_v37, %v1586_v11 }
 0xe3b   : > { %v1604_v38 = vsel %vm1603_vm10, %v1602_v34, %v1589_v36 }
 0xe3c   : > { %1605 = vst [vmem:[%s2191_s28] sm:$0xff] %v1604_v38 }
 0xe3d PF: > { %s15_s15 = sadd.s32 1, %s2009_s15  }
 0xe3e   : > { %p12_p1 = scmp.ge.s32.totalorder %s15_s15, 6  }
 0xe40   :  { %14 = sbr.rel (!%p12_p1) target bundleno = 1 (0x1), region = 74 }
 0xe45   :  { %1629 = vsyncpa [#allocation3], 1 }
 0xe46   :  { %1631 = vsyncpa [#allocation3 + $0x1], 1 }

</bundles_post_ra>
